<compile_context>
chip_gen: v6e
topology: v6e:2x2x1
jax: 0.10.0
libtpu: 0.0.40
codegen_flags: <defaults>
</compile_context>

<pallas_src>
import functools

import jax
import jax.numpy as jnp
from jax.experimental import pallas as pl
from jax.experimental.pallas import tpu as pltpu

_MiB = 1 << 20


# --------------------------------------------------------------------------
# Kernel
# --------------------------------------------------------------------------
def _ffn_kernel(x_ref, w13_ref, w2_ref, o_ref, acc_ref, *, th):
    # x_ref:   (tm, dim)        token tile (original x dtype)
    # w13_ref: (dim, 2*th)      fused [w1_tile | w3_tile] for hidden tile h
    # w2_ref:  (th, dim)        w2 (transposed) hidden tile h
    # o_ref:   (tm, dim)        output tile (written on the last hidden step)
    # acc_ref: (tm, dim) f32    persistent accumulator across the hidden axis
    h = pl.program_id(1)

    @pl.when(h == 0)
    def _():
        acc_ref[...] = jnp.zeros_like(acc_ref)

    # Cast the token tile to the weight compute dtype in VMEM (no extra HBM
    # pass); no-op when x and weights share a dtype.
    x = x_ref[...].astype(w13_ref.dtype)
    # One fused MXU matmul producing [h1 | h3] for this hidden tile, f32 acc.
    h13 = jnp.dot(x, w13_ref[...], preferred_element_type=jnp.float32)
    h1 = h13[:, :th]
    h3 = h13[:, th:]
    # SiLU gate in f32 on VPU/EUP.
    gated = (h1 * jax.nn.sigmoid(h1)) * h3
    # Second matmul, accumulate partial (tm, dim) contribution in f32.
    acc_ref[...] += jnp.dot(gated.astype(w2_ref.dtype), w2_ref[...],
                            preferred_element_type=jnp.float32)

    @pl.when(h == pl.num_programs(1) - 1)
    def _():
        o_ref[...] = acc_ref[...].astype(o_ref.dtype)


# --------------------------------------------------------------------------
# Config / weight preparation (one-time, outside the hot path)
# --------------------------------------------------------------------------
def _chip_kind():
    try:
        return jax.devices()[0].device_kind.lower()
    except Exception:
        return ""


def select_config(n_tokens, hidden, dim, *, w_itemsize=2, kind=None):
    """Pick (tm, th, vmem_cap_bytes) per TPU generation, clamped to the problem."""
    if kind is None:
        kind = _chip_kind()
    if "v7" in kind:
        # 64 MiB VMEM/TC: small weight double-buffers, tokens as big as fits.
        tm, th, cap = 512, 256, 52 * _MiB
    elif "v6" in kind:
        # 128 MiB VMEM, ridge ~680 flops/weight-byte: big token tiles, 256-mult.
        tm, th, cap = 1024, 512, 104 * _MiB
    elif "v5p" in kind:
        tm, th, cap = 512, 512, 100 * _MiB
    elif "v5" in kind:
        # Ridge ~240 flops/weight-byte: tm=256 already MXU-bound; 128-mult MXU.
        tm, th, cap = 256, 512, 100 * _MiB
    else:
        tm, th, cap = 512, 512, 96 * _MiB

    # Weights-resident variant: if a double-buffered copy of the full fused
    # weights fits comfortably, set th=hidden -> the weight index maps become
    # constant, Pallas fetches them once, and only tokens stream from HBM.
    if "v7" not in kind:
        full_w_bytes = 2 * (dim * 2 * hidden + hidden * dim) * w_itemsize
        if full_w_bytes <= 48 * _MiB:
            th = hidden

    tm = max(1, min(tm, n_tokens))
    th = max(1, min(th, hidden))
    return tm, th, cap


def prepare_weights(w1, w2, w3, *, th, compute_dtype=jnp.bfloat16):
    """One-time weight re-layout (call outside the hot path).

    w1, w3: (hidden, dim); w2: (dim, hidden) -- PyTorch nn.Linear (out, in).
    Returns a params dict carrying th so the interleaved layout and the kernel
    slicing can never silently diverge.
    """
    hidden, dim = w1.shape
    assert w2.shape == (dim, hidden) and w3.shape == (hidden, dim)
    assert hidden % th == 0, "hidden must be divisible by th"
    w1t = w1.T.astype(compute_dtype)   # (dim, hidden)
    w3t = w3.T.astype(compute_dtype)   # (dim, hidden)
    w2t = w2.T.astype(compute_dtype)   # (hidden, dim)
    nh = hidden // th
    w13 = jnp.concatenate(
        [w1t.reshape(dim, nh, th), w3t.reshape(dim, nh, th)], axis=2
    ).reshape(dim, 2 * hidden)
    return {"w13": w13, "w2t": w2t, "th": int(th),
            "hidden": int(hidden), "dim": int(dim)}


def _auto_vmem_limit(tm, th, dim, x_itemsize, w_itemsize, out_itemsize, cap):
    need = (2 * tm * dim * x_itemsize          # x double-buffer
            + 2 * dim * 2 * th * w_itemsize    # fused w13 double-buffer
            + 2 * th * dim * w_itemsize        # w2^T double-buffer
            + 2 * tm * dim * out_itemsize      # output double-buffer
            + tm * dim * 4)                    # f32 accumulator scratch
    need = int(need * 1.25) + 4 * _MiB         # headroom for compiler scratch
    return max(32 * _MiB, min(need, cap))


# --------------------------------------------------------------------------
# Wrapper
# --------------------------------------------------------------------------
def feed_forward(x, params, *, tm=None, out_dtype=None, vmem_limit_bytes=None):
    """x: (batch, seq, dim); params from prepare_weights."""
    batch, seq, dim = x.shape
    w13, w2t, th = params["w13"], params["w2t"], params["th"]
    hidden = params["hidden"]
    assert dim == params["dim"], "x feature dim does not match prepared weights"
    assert w13.shape == (dim, 2 * hidden) and w2t.shape == (hidden, dim)
    N = batch * seq

    cfg_tm, _, vmem_cap = select_config(N, hidden, dim,
                                        w_itemsize=w13.dtype.itemsize)
    if tm is None:
        tm = cfg_tm
    tm = min(tm, N)
    assert N % tm == 0, "batch*seq must be divisible by tm"
    assert hidden % th == 0

    # bf16 (or whatever the prepared weights use) writeback by default: do not
    # inherit f32 from x — it would double output DMA traffic for no benefit.
    if out_dtype is None:
        out_dtype = w13.dtype
    if vmem_limit_bytes is None:
        vmem_limit_bytes = _auto_vmem_limit(
            tm, th, dim, x.dtype.itemsize, w13.dtype.itemsize,
            jnp.dtype(out_dtype).itemsize, vmem_cap)

    x2d = x.reshape(N, dim)   # no dtype cast here: the kernel casts per tile

    kernel = functools.partial(_ffn_kernel, th=th)

    out = pl.pallas_call(
        kernel,
        out_shape=jax.ShapeDtypeStruct((N, dim), out_dtype),
        grid_spec=pltpu.PrefetchScalarGridSpec(
            num_scalar_prefetch=0,
            grid=(N // tm, hidden // th),      # token axis first, reduction last
            in_specs=[
                pl.BlockSpec((tm, dim), lambda i, h: (i, 0)),       # x tile
                pl.BlockSpec((dim, 2 * th), lambda i, h: (0, h)),   # fused w1|w3
                pl.BlockSpec((th, dim), lambda i, h: (h, 0)),       # w2^T tile
            ],
            out_specs=pl.BlockSpec((tm, dim), lambda i, h: (i, 0)), # lane-dense
            scratch_shapes=[pltpu.VMEM((tm, dim), jnp.float32)],    # f32 acc
        ),
        compiler_params=pltpu.CompilerParams(
            dimension_semantics=("parallel", "arbitrary"),
            vmem_limit_bytes=int(vmem_limit_bytes)),
    )(x2d, w13, w2t)
    return out.reshape(batch, seq, dim)


# --------------------------------------------------------------------------
# Parameter construction + reference
# --------------------------------------------------------------------------
def make_params(key, dim, hidden_dim, multiple_of, dtype=jnp.float32):
    # Replicate the __init__ hidden-dim arithmetic.
    hidden = int(2 * hidden_dim / 3)
    hidden = multiple_of * ((hidden + multiple_of - 1) // multiple_of)
    k1, k2, k3 = jax.random.split(key, 3)
    # nn.Linear weight shape is (out_features, in_features).
    w1 = jax.random.normal(k1, (hidden, dim), dtype) * 0.02
    w2 = jax.random.normal(k2, (dim, hidden), dtype) * 0.02
    w3 = jax.random.normal(k3, (hidden, dim), dtype) * 0.02
    return w1, w2, w3


def _reference(x, w1, w2, w3):
    h1 = x @ w1.T
    h3 = x @ w3.T
    silu = h1 * jax.nn.sigmoid(h1)
    return (silu * h3) @ w2.T


if __name__ == "__main__":
    batch, seq, dim = 2, 8, 32
    hidden_dim_arg, multiple_of = 64, 32   # -> hidden = 64

    key = jax.random.PRNGKey(0)
    kx, kw = jax.random.split(key)
    x = jax.random.normal(kx, (batch, seq, dim), jnp.float32)
    w1, w2, w3 = make_params(kw, dim, hidden_dim_arg, multiple_of)

    hidden = w1.shape[0]
    N = batch * seq
    tm, th, _ = select_config(N, hidden, dim)   # chip-aware, clamped to toy shapes

    # --- default bf16 compute path (MXU-native weights, bf16 writeback) ---
    params_bf = prepare_weights(w1, w2, w3, th=th)           # bf16 by default
    y_bf = feed_forward(x, params_bf, tm=tm)
    y_bf = jax.block_until_ready(y_bf)
    assert y_bf.shape == (batch, seq, dim)
    assert y_bf.dtype == jnp.bfloat16
    rt = lambda a: a.astype(jnp.bfloat16).astype(jnp.float32)  # bf16 round-trip
    y_ref_bf = _reference(rt(x), rt(w1), rt(w2), rt(w3))
    assert jnp.allclose(y_bf.astype(jnp.float32), y_ref_bf, atol=5e-3, rtol=1e-1), \
        "bf16 mismatch vs reference"

    # --- f32 path (tight-tolerance correctness check) ---
    params_f32 = prepare_weights(w1, w2, w3, th=th, compute_dtype=jnp.float32)
    y = feed_forward(x, params_f32, tm=tm)
    y = jax.block_until_ready(y)
    y_ref = _reference(x, w1, w2, w3)
    assert y.shape == (batch, seq, dim)
    assert jnp.allclose(y, y_ref, atol=1e-4, rtol=1e-4), "f32 mismatch vs reference"

    print("KERNEL_OK")
</pallas_src>

<mosaic_0001>
module attributes {stable_mosaic.version = 11 : i64} {
  func.func @_ffn_kernel(%arg0: i32, %arg1: i32, %arg2: memref<16x32xf32, #tpu.memory_space<vmem>>, %arg3: memref<32x128xbf16, #tpu.memory_space<vmem>>, %arg4: memref<64x32xbf16, #tpu.memory_space<vmem>>, %arg5: memref<16x32xbf16, #tpu.memory_space<vmem>>, %arg6: memref<16x32xf32, #tpu.memory_space<vmem>>) attributes {dimension_semantics = [#tpu.dimension_semantics<parallel>, #tpu.dimension_semantics<arbitrary>], iteration_bounds = array<i64: 1, 1>, scalar_prefetch = 0 : i64, scratch_operands = 1 : i64, tpu.core_type = #tpu.core_type<tc>, window_params = [{transform_indices = @transform_0, window_bounds = array<i64: 16, 32>}, {transform_indices = @transform_1, window_bounds = array<i64: 32, 128>}, {transform_indices = @transform_2, window_bounds = array<i64: 64, 32>}, {transform_indices = @transform_3, window_bounds = array<i64: 16, 32>}]} {
    %c0_i32 = arith.constant 0 : i32
    %0 = arith.cmpi eq, %arg1, %c0_i32 : i32
    %1 = arith.extui %0 : i1 to i32
    %c0_i32_0 = arith.constant 0 : i32
    %2 = arith.cmpi ne, %1, %c0_i32_0 : i32
    scf.if %2 {
      %cst_14 = arith.constant 0.000000e+00 : f32
      %25 = vector.broadcast %cst_14 : f32 to vector<16x32xf32>
      %c0_15 = arith.constant 0 : index
      %c0_16 = arith.constant 0 : index
      %26 = vector.load %arg6[%c0_15, %c0_16] : memref<16x32xf32, #tpu.memory_space<vmem>>, vector<16x32xf32>
      tpu.vector_store %arg6[%c0_15, %c0_16], %25 {strides = array<i32>} : memref<16x32xf32, #tpu.memory_space<vmem>>, vector<16x32xf32>,
    } else {
    }
    %c0 = arith.constant 0 : index
    %c0_1 = arith.constant 0 : index
    %3 = vector.load %arg2[%c0, %c0_1] : memref<16x32xf32, #tpu.memory_space<vmem>>, vector<16x32xf32>
    %4 = arith.truncf %3 : vector<16x32xf32> to vector<16x32xbf16>
    %c0_2 = arith.constant 0 : index
    %c0_3 = arith.constant 0 : index
    %5 = vector.load %arg3[%c0_2, %c0_3] : memref<32x128xbf16, #tpu.memory_space<vmem>>, vector<32x128xbf16>
    %cst = arith.constant dense<0.000000e+00> : vector<16x128xf32>
    %6 = tpu.matmul %4, %5, %cst {dimension_numbers = #tpu.dot_dimension_numbers<[1], [0], [0], [1], [0, 0, 1, 1], [], []>} : vector<16x32xbf16>, vector<32x128xbf16>, vector<16x128xf32> -> vector<16x128xf32>
    %7 = vector.extract_strided_slice %6 {offsets = [0, 0], sizes = [16, 64], strides = [1, 1]} : vector<16x128xf32> to vector<16x64xf32>
    %8 = vector.extract_strided_slice %6 {offsets = [0, 64], sizes = [16, 64], strides = [1, 1]} : vector<16x128xf32> to vector<16x64xf32>
    %9 = arith.negf %7 : vector<16x64xf32>
    %10 = math.exp %9 : vector<16x64xf32>
    %cst_4 = arith.constant 1.000000e+00 : f32
    %11 = vector.broadcast %cst_4 : f32 to vector<16x64xf32>
    %12 = arith.addf %11, %10 : vector<16x64xf32>
    %13 = arith.divf %11, %12 : vector<16x64xf32>
    %14 = arith.mulf %7, %13 : vector<16x64xf32>
    %15 = arith.mulf %14, %8 : vector<16x64xf32>
    %c0_5 = arith.constant 0 : index
    %c0_6 = arith.constant 0 : index
    %16 = vector.load %arg6[%c0_5, %c0_6] : memref<16x32xf32, #tpu.memory_space<vmem>>, vector<16x32xf32>
    %17 = arith.truncf %15 : vector<16x64xf32> to vector<16x64xbf16>
    %c0_7 = arith.constant 0 : index
    %c0_8 = arith.constant 0 : index
    %18 = vector.load %arg4[%c0_7, %c0_8] : memref<64x32xbf16, #tpu.memory_space<vmem>>, vector<64x32xbf16>
    %cst_9 = arith.constant dense<0.000000e+00> : vector<16x32xf32>
    %19 = tpu.matmul %17, %18, %cst_9 {dimension_numbers = #tpu.dot_dimension_numbers<[1], [0], [0], [1], [0, 0, 1, 1], [], []>} : vector<16x64xbf16>, vector<64x32xbf16>, vector<16x32xf32> -> vector<16x32xf32>
    %20 = arith.addf %16, %19 : vector<16x32xf32>
    %c0_10 = arith.constant 0 : index
    %c0_11 = arith.constant 0 : index
    %21 = vector.load %arg6[%c0_10, %c0_11] : memref<16x32xf32, #tpu.memory_space<vmem>>, vector<16x32xf32>
    tpu.vector_store %arg6[%c0_10, %c0_11], %20 {strides = array<i32>} : memref<16x32xf32, #tpu.memory_space<vmem>>, vector<16x32xf32>,
    %c0_i32_12 = arith.constant 0 : i32
    %22 = arith.cmpi eq, %arg1, %c0_i32_12 : i32
    %23 = arith.extui %22 : i1 to i32
    %c0_i32_13 = arith.constant 0 : i32
    %24 = arith.cmpi ne, %23, %c0_i32_13 : i32
    scf.if %24 {
      %c0_14 = arith.constant 0 : index
      %c0_15 = arith.constant 0 : index
      %25 = vector.load %arg6[%c0_14, %c0_15] : memref<16x32xf32, #tpu.memory_space<vmem>>, vector<16x32xf32>
      %26 = arith.truncf %25 : vector<16x32xf32> to vector<16x32xbf16>
      %c0_16 = arith.constant 0 : index
      %c0_17 = arith.constant 0 : index
      %27 = vector.load %arg5[%c0_16, %c0_17] : memref<16x32xbf16, #tpu.memory_space<vmem>>, vector<16x32xbf16>
      tpu.vector_store %arg5[%c0_16, %c0_17], %26 {strides = array<i32>} : memref<16x32xbf16, #tpu.memory_space<vmem>>, vector<16x32xbf16>,
    } else {
    }
    return
  }
  func.func @transform_0(%arg0: i32, %arg1: i32) -> (i32, i32) {
    %c0_i32 = arith.constant 0 : i32
    %c0_i32_0 = arith.constant 0 : i32
    return %arg0, %c0_i32 : i32, i32
  }
  func.func @transform_1(%arg0: i32, %arg1: i32) -> (i32, i32) {
    %c0_i32 = arith.constant 0 : i32
    %c0_i32_0 = arith.constant 0 : i32
    return %c0_i32, %arg1 : i32, i32
  }
  func.func @transform_2(%arg0: i32, %arg1: i32) -> (i32, i32) {
    %c0_i32 = arith.constant 0 : i32
    %c0_i32_0 = arith.constant 0 : i32
    return %arg1, %c0_i32 : i32, i32
  }
  func.func @transform_3(%arg0: i32, %arg1: i32) -> (i32, i32) {
    %c0_i32 = arith.constant 0 : i32
    %c0_i32_0 = arith.constant 0 : i32
    return %arg0, %c0_i32 : i32, i32
  }
}

</mosaic_0001>

<bundles_post_ra>
// kernel: tpu_custom_call.1
= control target key start
LH: loop header
LB: loop body
LE: loop exit
PB: predicated region body
PF: predicated region fallthrough
CT: control target
= control target key end

     0   :  { %v310_v1 = vmov 0.0   ;;  %vm311_vm0 = vmmov 0   ;;  %vm20_vm1 = vcmask 261120   ;;  %s371_s0 = inlined_call_operand.vmem [shape: f32[16,32], index: 0, kind: input, shape index: {}]   ;;  %s372_s1 = inlined_call_operand.vmem [shape: bf16[32,128], index: 1, kind: input, shape index: {}]   ;;  %s373_s2 = inlined_call_operand.vmem [shape: bf16[64,32], index: 2, kind: input, shape index: {}]   ;;  %s374_s3 = inlined_call_operand.hbm [shape: bf16[16,32], index: 3, kind: output, shape index: {}]  }
   0x1   :  { %v274_v0 = vld [vmem:[%s372_s1 + $0x8] sm:$0xff]   ;;  %249 = vmatprep.subr.bf16.mxu0 %v310_v1  ;;  %v275_v2 = vld [vmem:[%s372_s1] sm:$0xff]   ;;  %257 = vmatprep.subr.bf16.mxu1 %v310_v1  ;;  %21 = vst.msk [vmem:[#allocation2] sm:$0xff] %vm20_vm1, %v310_v1  ;;  %22 = vst.msk [vmem:[#allocation2 + $0x8] sm:$0xff] %vm20_vm1, %v310_v1 }
   0x2   :  { %250 = vmatpush3.bf16.msra.mxu0 %v274_v0  ;;  %253 = vmatprep.mubr.msk.bf16.mxu0 %vm311_vm0, %v310_v1  ;;  %v23_v3 = vld [vmem:[%s371_s0] sm:$0xff]  ;;  %v24_v4 = vld [vmem:[%s371_s0 + $0x8] sm:$0xff] }
   0x3   :  { %251 = vmatprep.subr.bf16.mxu0 %v310_v1  ;;  %265 = vmatprep.mubr.msk.bf16.mxu1 %vm311_vm0, %v310_v1  ;;  %v25_v5 = vpack.c.bf16 %v24_v4, %v23_v3 }
   0x4   :  { %8 = vsyncpa [#allocation4], 0  ;;  %v276_v6 = vld [vmem:[%s373_s2 + $0x18] sm:$0xff]   ;;  %v277_v7 = vld [vmem:[%s373_s2 + $0x10] sm:$0xff]   ;;  %s312_s26 = smov 64   ;;  %vm146_vm2 = vcmask 523264  }
   0x5   :  { %258 = vmatpush3.bf16.msra.mxu1 %v276_v6  ;;  %v278_v8 = vld [vmem:[%s373_s2 + $0x8] sm:$0xff]   ;;  %v279_v9 = vld [vmem:[%s373_s2] sm:$0xff]   ;;  %vm208_vm3 = vcmask 257024   ;;  %s313_s2 = smov [#allocation3]  }
   0x6   :  { %252 = vmatpush3.bf16.msra.mxu0 %v275_v2  ;;  %259 = vmatprep.subr.bf16.mxu1 %v310_v1  ;;  %s216_s27 = sshll.u32 %s313_s2, 4  ;;  %s217_s27 = int_to_ptr.vmem [resolvable:$true] %s216_s27 }
   0x7   :  { %s288_s28 = scalar_lea.vmem %s217_s27, 128  ;;  %p293_p1 = scmp.lt.s32.totalorder %s217_s27, %s217_s27 }
   0x8   :  { %v111_v29 = vld [vmem:[#allocation2] sm:$0xff]  ;;  %v112_v33 = vld [vmem:[#allocation2 + $0x8] sm:$0xff]  ;;  %p289_p0 = scmp.ne.s32.totalorder %s217_s27, %s288_s28  ;;  %p294_p2 = scmp.lt.s32.totalorder %s288_s28, %s288_s28 }
   0x9   :  { %254 = vmatmul.mubr.msk.bf16.vlgmr.msra.gmra.mxu0 %vm20_vm1, %v25_v5  ;;  %260 = vmatpush3.bf16.msra.mxu1 %v277_v7 }
   0xa   :  { %261 = vmatprep.subr.bf16.mxu1 %v310_v1  ;;  %p295_p3 = por %p294_p2, %p293_p1 }
   0xc   :  { %p296_p4 = pnand %p295_p3, %p289_p0 }
   0xd   :  { %262 = vmatpush3.bf16.msra.mxu1 %v278_v8 }
   0xe   :  { %263 = vmatprep.subr.bf16.mxu1 %v310_v1 }
  0x11   :  { %264 = vmatpush3.bf16.msra.mxu1 %v279_v9 }
  0xc9   :  { %v80_v10 = vpop.f32.mrf.mxu0 }
  0xca   :  { %103 = vrot.lane.b32.xlu0 %v80_v10, %s312_s26  ;;  %v230_v14 = vmul.f32 -1.442695, %v80_v10 }
  0xcb   :  { %v255_v11 = vpop.f32.mrf.mxu0 }
  0xcc   :  { %280 = vpow2.f32 %v230_v14 }
  0xcd   :  { %v83_v12 = vpop.f32.mrf.mxu0 }
  0xce   :  { %105 = vrot.lane.b32.xlu0 %v83_v12, %s312_s26  ;;  %v231_v15 = vmul.f32 -1.442695, %v83_v12 }
  0xcf   :  { %v256_v13 = vpop.f32.mrf.mxu0 }
  0xd0   :  { %282 = vpow2.f32 %v231_v15 }
  0xd9   :  { %v281_v16 = vpop.eup %280 }
  0xda   :  { %v93_v18 = vadd.f32 1.0, %v281_v16 }
  0xdc   :  { %284 = vrcp.f32 %v93_v18 }
  0xdd   :  { %v283_v17 = vpop.eup %282 }
  0xde   :  { %v94_v19 = vadd.f32 1.0, %v283_v17 }
  0xe0   :  { %286 = vrcp.f32 %v94_v19 }
  0xe9   :  { %v285_v20 = vpop.eup %284 }
  0xea   :  { %v99_v23 = vmul.f32 %v285_v20, %v80_v10 }
  0xed   :  { %v287_v21 = vpop.eup %286 }
  0xee   :  { %v100_v24 = vmul.f32 %v287_v21, %v83_v12 }
 0x13c   :  { %v104_v22 = vpop.permute.xlu0 %103 }
 0x13d   :  { %v109_v26 = vmul.f32 %v104_v22, %v99_v23 }
 0x140   :  { %v106_v25 = vpop.permute.xlu0 %105 }
 0x141   :  { %v110_v27 = vmul.f32 %v106_v25, %v100_v24 }
 0x143   :  { %v113_v28 = vpack.c.bf16 %v110_v27, %v109_v26 }
 0x145   :  { %266 = vmatmul.mubr.msk.bf16.vlgmr.msra.gmra.mxu1 %vm146_vm2, %v113_v28 }
 0x205   :  { %v184_v30 = vpop.f32.mrf.mxu1 }
 0x206   :  { %v191_v31 = vadd.f32 %v184_v30, %v111_v29 }
 0x207   :  { %v267_v32 = vpop.f32.mrf.mxu1 }
 0x208   :  { %193 = vst.msk [vmem:[#allocation2] sm:$0xff] %vm20_vm1, %v191_v31 }
 0x209   :  { %v187_v34 = vpop.f32.mrf.mxu1 }
 0x20a   :  { %v192_v35 = vadd.f32 %v187_v34, %v112_v33 }
 0x20b   :  { %v268_v36 = vpop.f32.mrf.mxu1 }
 0x20c   :  { %194 = vst.msk [vmem:[#allocation2 + $0x8] sm:$0xff] %vm20_vm1, %v192_v35 }
 0x20f   :  { %v198_v37 = vld [vmem:[#allocation2] sm:$0xff] }
 0x210   :  { %v239_v38 = vpack.c.bf16 %v198_v37, %v198_v37 }
 0x212   :  { %209 = vst.msk [vmem:[#allocation3] sm:$0xf] %vm208_vm3, %v239_v38 }
 0x213   :  { %v199_v39 = vld [vmem:[#allocation2 + $0x8] sm:$0xff] }
 0x214   :  { %v240_v40 = vpack.c.bf16 %v199_v39, %v199_v39 }
 0x216   :  { %210 = vst.msk [vmem:[#allocation3 + $0x4] sm:$0xf] %vm208_vm3, %v240_v40 }
 0x217   :  { %299 = shalt.err (!%p296_p4)
}
 0x218   :  { %s314_s29 = smov 4  }
 0x219   :  { %222 = dma.vmem_to_hbm [thread:$0]  %s217_s27, 128, %s374_s3, [#allocation4], %s312_s26, %s312_s26, %s314_s29  }
 0x21a   :  { %308 = dma.done.wait [#allocation4], 128  }
 0x21b   :  { %309 = vsyncadd [#allocation4], 4294967168 }
 0x21c   :  { %226 = vsyncpa [#allocation4], 1 }

</bundles_post_ra>
